<compile_context>
chip_gen: v7x
topology: tpu7x:2x2x1
jax: 0.10.0
libtpu: 0.0.40
codegen_flags: <defaults>
</compile_context>

<pallas_src>
import functools
import math

import jax
import jax.numpy as jnp
from jax.experimental import pallas as pl
from jax.experimental.pallas import tpu as pltpu


def _round_up(x, m):
    return ((x + m - 1) // m) * m


def _choose_bm(M, block_m):
    bm = max(8, min(block_m, _round_up(M, 8)))
    # v7x has 2 TensorCores; make sure the "parallel" node axis has >= 2 steps
    # whenever the level is large enough to split (no-op on v5e/v6e: 1 TC).
    if M >= 16 and pl.cdiv(M, bm) < 2:
        bm = _round_up(pl.cdiv(M, 2), 8)
    return bm


def tree_lstm_kernel(x_ref, hc_ref, wx_ref, wh_ref, uf_ref, b_ref, out_ref, *,
                     hidden_dim):
    """One block of `bm` tree nodes.

    x_ref  : (bm, D)       node inputs (f32)
    hc_ref : (N, bm, 2H)   child-major fused [h | c] children (f32, zero-padded slots)
    wx_ref : (D, 4H)       fused [W_iou | W_f]                       (bf16)
    wh_ref : (2H, 4H)      [[U_iou | 0], [0 | 0]]  (zero c rows)     (bf16)
    uf_ref : (2H, H)       [[U_f], [0]]            (zero c rows)     (bf16)
    b_ref  : (1, 4H)       [W_iou_b + U_iou_b | W_f_b + U_f_b]       (f32)
    out_ref: (bm, 2H)      [h | c]
    """
    H = hidden_dim
    N, bm, _ = hc_ref.shape

    wx = wx_ref[...]
    wh = wh_ref[...]
    uf = uf_ref[...]
    b = b_ref[...]

    x = x_ref[...]                                                # (bm, D)
    hc = hc_ref[...]                                              # (N, bm, 2H)

    # Linearity of U_iou: sum children first (N-1 lane-dense vector adds),
    # then a single GEMM.  The c lanes of hc_sum hit zero rows of Wh (exact).
    hc_sum = jnp.sum(hc, axis=0)                                  # (bm, 2H)

    gates = (jnp.dot(x.astype(wx.dtype), wx,
                     preferred_element_type=jnp.float32)
             + jnp.dot(hc_sum.astype(wh.dtype), wh,
                       preferred_element_type=jnp.float32)
             + b)                                                 # (bm, 4H)

    # One EUP pass over a full 128-lane tile for i|o.
    io = jax.nn.sigmoid(gates[:, :2 * H])
    i = io[:, :H]
    o = io[:, H:]
    uu = jnp.tanh(gates[:, 2 * H:3 * H])
    wfx = gates[:, 3 * H:]                        # W_f x + W_f_b + U_f_b

    # Stacked forget path: ONE (N*bm, 2H) @ (2H, H) GEMM covers every child
    # slot (long MXU M dimension); c lanes hit zero rows of Uf (exact).
    hc_flat = hc.reshape(N * bm, 2 * H).astype(uf.dtype)
    f_pre = jnp.dot(hc_flat, uf,
                    preferred_element_type=jnp.float32).reshape(N, bm, H)
    f = jax.nn.sigmoid(f_pre + wfx[None, :, :])                   # (N, bm, H)
    fc = jnp.sum(f * hc[:, :, H:], axis=0)        # padded child slots add 0

    c = i * uu + fc                                               # (bm, H)
    h = o * jnp.tanh(c)                                           # (bm, H)

    # Single lane-dense (bm, 2H) store.
    out_ref[...] = jnp.concatenate([h, c], axis=-1)


def init_params(key, input_dim, hidden_dim):
    """Matches nn.Linear default init; weights stored as (in, out)."""
    def linear(key, fan_in, fan_out):
        kw, kb = jax.random.split(key)
        bound = 1.0 / math.sqrt(fan_in)
        w = jax.random.uniform(kw, (fan_in, fan_out), jnp.float32, -bound, bound)
        b = jax.random.uniform(kb, (fan_out,), jnp.float32, -bound, bound)
        return w, b

    k1, k2, k3, k4 = jax.random.split(key, 4)
    W_iou_w, W_iou_b = linear(k1, input_dim, 3 * hidden_dim)
    U_iou_w, U_iou_b = linear(k2, hidden_dim, 3 * hidden_dim)
    W_f_w, W_f_b = linear(k3, input_dim, hidden_dim)
    U_f_w, U_f_b = linear(k4, hidden_dim, hidden_dim)
    return dict(W_iou_w=W_iou_w, W_iou_b=W_iou_b,
                U_iou_w=U_iou_w, U_iou_b=U_iou_b,
                W_f_w=W_f_w, W_f_b=W_f_b,
                U_f_w=U_f_w, U_f_b=U_f_b)


def fuse_params(params, weight_dtype=jnp.bfloat16):
    """Done ONCE after init (not per call): fuse weights, pre-sum biases."""
    D = params["W_iou_w"].shape[0]
    H = params["W_f_w"].shape[1]
    # x-side of all four gates in one operand.
    Wx = jnp.concatenate([params["W_iou_w"], params["W_f_w"]], axis=1)      # (D, 4H)
    # h_sum-side: zero rows for the fused c lanes, zero forget column (the
    # forget h-path goes through the stacked Uf GEMM instead).
    Wh = jnp.zeros((2 * H, 4 * H), jnp.float32).at[:H, :3 * H].set(params["U_iou_w"])
    # Stacked forget weights, zero rows for the fused c lanes.
    Uf = jnp.zeros((2 * H, H), jnp.float32).at[:H, :].set(params["U_f_w"])
    b = jnp.concatenate([params["W_iou_b"] + params["U_iou_b"],
                         params["W_f_b"] + params["U_f_b"]])[None, :]
    return dict(Wx=Wx.astype(weight_dtype), Wh=Wh.astype(weight_dtype),
                Uf=Uf.astype(weight_dtype), b=b.astype(jnp.float32),
                hidden_dim=H, input_dim=D)


def tree_lstm_level(x, hc_children, fused, *, block_m=512):
    """Batched TreeLSTMCell forward for a whole tree level.

    x:           (M, D) f32
    hc_children: (N, M, 2H) f32 child-major fused [h | c] (zero-padded child
                 slots), i.e. exactly the (., 2H) slab a previous level emits.
                 Pass None for leaf levels.
    Returns (h, c), each (M, H).
    """
    H = fused["hidden_dim"]
    x = jnp.asarray(x, jnp.float32)
    M, D = x.shape
    if hc_children is None:
        hc_children = jnp.zeros((1, M, 2 * H), jnp.float32)
    hc_children = jnp.asarray(hc_children, jnp.float32)
    N = hc_children.shape[0]
    assert hc_children.shape == (N, M, 2 * H), hc_children.shape

    # Only pad when the level has fewer than one sublane granule of nodes;
    # otherwise rely on the cdiv grid (OOB tail rows are row-independent and
    # sliced off below).
    Mk = M
    if M < 8:
        Mk = 8
        x = jnp.pad(x, ((0, Mk - M), (0, 0)))
        hc_children = jnp.pad(hc_children, ((0, 0), (0, Mk - M), (0, 0)))

    bm = _choose_bm(Mk, block_m)
    grid = (pl.cdiv(Mk, bm),)

    kernel = functools.partial(tree_lstm_kernel, hidden_dim=H)

    out = pl.pallas_call(
        kernel,
        out_shape=jax.ShapeDtypeStruct((Mk, 2 * H), jnp.float32),
        grid_spec=pltpu.PrefetchScalarGridSpec(
            num_scalar_prefetch=0,
            grid=grid,
            in_specs=[
                pl.BlockSpec((bm, D), lambda i: (i, 0)),
                pl.BlockSpec((N, bm, 2 * H), lambda i: (0, i, 0)),
                # Weights / bias: constant index_map -> DMA'd once, VMEM-resident.
                pl.BlockSpec((D, 4 * H), lambda i: (0, 0)),
                pl.BlockSpec((2 * H, 4 * H), lambda i: (0, 0)),
                pl.BlockSpec((2 * H, H), lambda i: (0, 0)),
                pl.BlockSpec((1, 4 * H), lambda i: (0, 0)),
            ],
            out_specs=pl.BlockSpec((bm, 2 * H), lambda i: (i, 0)),
        ),
        compiler_params=pltpu.CompilerParams(
            dimension_semantics=("parallel",)),
    )(x, hc_children, fused["Wx"], fused["Wh"], fused["Uf"], fused["b"])

    out = out[:M]
    return out[:, :H], out[:, H:]


def tree_lstm_cell(x, h_children, c_children, fused):
    """Single-node forward matching the PyTorch module API; returns (H,) vectors."""
    if h_children is None or c_children is None:
        hc = None
    else:
        hc = jnp.concatenate([jnp.asarray(h_children, jnp.float32),
                              jnp.asarray(c_children, jnp.float32)],
                             axis=-1)[:, None, :]                 # (N, 1, 2H)
    h, c = tree_lstm_level(x[None, :], hc, fused)
    return h[0], c[0]


def tree_lstm_ref(x, h_children, c_children, params, hidden_dim):
    """Pure-JAX f32 reference mirroring the PyTorch forward (single node)."""
    if h_children is None or c_children is None:
        h_children = jnp.zeros((1, hidden_dim), jnp.float32)
        c_children = jnp.zeros((1, hidden_dim), jnp.float32)
    h_sum = jnp.sum(h_children, axis=0)
    iou = (x @ params["W_iou_w"] + params["W_iou_b"]
           + h_sum @ params["U_iou_w"] + params["U_iou_b"])
    i, o, u = jnp.split(iou, 3, axis=-1)
    i, o, u = jax.nn.sigmoid(i), jax.nn.sigmoid(o), jnp.tanh(u)
    wfx = x @ params["W_f_w"] + params["W_f_b"]
    f = jax.nn.sigmoid(wfx[None, :] + h_children @ params["U_f_w"] + params["U_f_b"])
    c = i * u + jnp.sum(f * c_children, axis=0)
    h = o * jnp.tanh(c)
    return h, c


if __name__ == "__main__":
    input_dim, hidden_dim = 32, 64     # 4H = 256 gate slab, 2H = 128 lane-dense children/output
    n_nodes, n_children = 16, 4        # one tree level; 16 nodes -> 2 node blocks on the parallel axis

    key = jax.random.PRNGKey(0)
    kp, kx, kh, kc = jax.random.split(key, 4)

    params = init_params(kp, input_dim, hidden_dim)
    fused = fuse_params(params, weight_dtype=jnp.bfloat16)

    x = jax.random.normal(kx, (n_nodes, input_dim), jnp.float32)
    # Children constructed directly in the kernel's child-major fused [h|c]
    # layout (N, M, 2H) -- exactly what a previous level's kernel emits -- so
    # no wrapper-side transpose / re-pack passes over HBM.
    h_children = jax.random.normal(kh, (n_children, n_nodes, hidden_dim), jnp.float32)
    c_children = jax.random.normal(kc, (n_children, n_nodes, hidden_dim), jnp.float32)
    # Variable per-node child counts handled by zero-padding (exact, no recompiles).
    counts = jnp.array([4, 3, 1, 2, 4, 0, 2, 3, 1, 4, 2, 0, 3, 4, 1, 2])
    child_mask = (jnp.arange(n_children)[:, None] < counts[None, :]).astype(jnp.float32)
    h_children = h_children * child_mask[:, :, None]
    c_children = c_children * child_mask[:, :, None]
    hc_children = jnp.concatenate([h_children, c_children], axis=-1)   # (N, M, 2H)

    h, c = tree_lstm_level(x, hc_children, fused)
    jax.block_until_ready((h, c))

    # Correctness vs. pure-f32 per-node reference (bf16 weights -> loose-ish atol).
    max_err = 0.0
    for m in range(n_nodes):
        h_ref, c_ref = tree_lstm_ref(x[m], h_children[:, m, :], c_children[:, m, :],
                                     params, hidden_dim)
        max_err = max(max_err,
                      float(jnp.max(jnp.abs(h[m] - h_ref))),
                      float(jnp.max(jnp.abs(c[m] - c_ref))))
    assert max_err < 2e-2, f"batched mismatch: max abs err {max_err}"

    # Leaf node (None children) through the single-node, module-like API.
    h0, c0 = tree_lstm_cell(x[0], None, None, fused)
    jax.block_until_ready((h0, c0))
    h0_ref, c0_ref = tree_lstm_ref(x[0], None, None, params, hidden_dim)
    assert float(jnp.max(jnp.abs(h0 - h0_ref))) < 2e-2, "leaf h mismatch"
    assert float(jnp.max(jnp.abs(c0 - c0_ref))) < 2e-2, "leaf c mismatch"

    print("KERNEL_OK")
</pallas_src>

<mosaic_0001>
module attributes {stable_mosaic.version = 11 : i64} {
  func.func @tree_lstm_kernel(%arg0: i32, %arg1: memref<8x32xf32, #tpu.memory_space<vmem>>, %arg2: memref<4x8x128xf32, #tpu.memory_space<vmem>>, %arg3: memref<32x256xbf16, #tpu.memory_space<vmem>>, %arg4: memref<128x256xbf16, #tpu.memory_space<vmem>>, %arg5: memref<128x64xbf16, #tpu.memory_space<vmem>>, %arg6: memref<1x256xf32, #tpu.memory_space<vmem>>, %arg7: memref<8x128xf32, #tpu.memory_space<vmem>>) attributes {dimension_semantics = [#tpu.dimension_semantics<parallel>], iteration_bounds = array<i64: 2>, scalar_prefetch = 0 : i64, scratch_operands = 0 : i64, tpu.core_type = #tpu.core_type<tc>, window_params = [{transform_indices = @transform_0, window_bounds = array<i64: 8, 32>}, {transform_indices = @transform_1, window_bounds = array<i64: 4, 8, 128>}, {pipeline_mode = #tpu.pipeline_mode<synchronous>, transform_indices = @transform_2, window_bounds = array<i64: 32, 256>}, {pipeline_mode = #tpu.pipeline_mode<synchronous>, transform_indices = @transform_3, window_bounds = array<i64: 128, 256>}, {pipeline_mode = #tpu.pipeline_mode<synchronous>, transform_indices = @transform_4, window_bounds = array<i64: 128, 64>}, {pipeline_mode = #tpu.pipeline_mode<synchronous>, transform_indices = @transform_5, window_bounds = array<i64: 1, 256>}, {transform_indices = @transform_6, window_bounds = array<i64: 8, 128>}]} {
    %c0 = arith.constant 0 : index
    %c0_0 = arith.constant 0 : index
    %0 = vector.load %arg3[%c0, %c0_0] : memref<32x256xbf16, #tpu.memory_space<vmem>>, vector<32x256xbf16>
    %c0_1 = arith.constant 0 : index
    %c0_2 = arith.constant 0 : index
    %1 = vector.load %arg4[%c0_1, %c0_2] : memref<128x256xbf16, #tpu.memory_space<vmem>>, vector<128x256xbf16>
    %c0_3 = arith.constant 0 : index
    %c0_4 = arith.constant 0 : index
    %2 = vector.load %arg5[%c0_3, %c0_4] : memref<128x64xbf16, #tpu.memory_space<vmem>>, vector<128x64xbf16>
    %c0_5 = arith.constant 0 : index
    %c0_6 = arith.constant 0 : index
    %3 = vector.load %arg6[%c0_5, %c0_6] : memref<1x256xf32, #tpu.memory_space<vmem>>, vector<1x256xf32>
    %c0_7 = arith.constant 0 : index
    %c0_8 = arith.constant 0 : index
    %4 = vector.load %arg1[%c0_7, %c0_8] : memref<8x32xf32, #tpu.memory_space<vmem>>, vector<8x32xf32>
    %c0_9 = arith.constant 0 : index
    %c0_10 = arith.constant 0 : index
    %c0_11 = arith.constant 0 : index
    %5 = vector.load %arg2[%c0_9, %c0_10, %c0_11] : memref<4x8x128xf32, #tpu.memory_space<vmem>>, vector<4x8x128xf32>
    %cst = arith.constant dense<0.000000e+00> : vector<8x128xf32>
    %6 = vector.multi_reduction <add>, %5, %cst [0] : vector<4x8x128xf32> to vector<8x128xf32>
    %7 = arith.truncf %4 : vector<8x32xf32> to vector<8x32xbf16>
    %cst_12 = arith.constant dense<0.000000e+00> : vector<8x256xf32>
    %8 = tpu.matmul %7, %0, %cst_12 {dimension_numbers = #tpu.dot_dimension_numbers<[1], [0], [0], [1], [0, 0, 1, 1], [], []>} : vector<8x32xbf16>, vector<32x256xbf16>, vector<8x256xf32> -> vector<8x256xf32>
    %9 = arith.truncf %6 : vector<8x128xf32> to vector<8x128xbf16>
    %cst_13 = arith.constant dense<0.000000e+00> : vector<8x256xf32>
    %10 = tpu.matmul %9, %1, %cst_13 {dimension_numbers = #tpu.dot_dimension_numbers<[1], [0], [0], [1], [0, 0, 1, 1], [], []>} : vector<8x128xbf16>, vector<128x256xbf16>, vector<8x256xf32> -> vector<8x256xf32>
    %11 = arith.addf %8, %10 : vector<8x256xf32>
    %12 = vector.broadcast %3 : vector<1x256xf32> to vector<8x256xf32>
    %13 = arith.addf %11, %12 : vector<8x256xf32>
    %14 = vector.extract_strided_slice %13 {offsets = [0, 0], sizes = [8, 128], strides = [1, 1]} : vector<8x256xf32> to vector<8x128xf32>
    %15 = arith.negf %14 : vector<8x128xf32>
    %16 = math.exp %15 : vector<8x128xf32>
    %cst_14 = arith.constant 1.000000e+00 : f32
    %17 = vector.broadcast %cst_14 : f32 to vector<8x128xf32>
    %18 = arith.addf %17, %16 : vector<8x128xf32>
    %19 = arith.divf %17, %18 : vector<8x128xf32>
    %20 = vector.extract_strided_slice %19 {offsets = [0, 0], sizes = [8, 64], strides = [1, 1]} : vector<8x128xf32> to vector<8x64xf32>
    %21 = vector.extract_strided_slice %19 {offsets = [0, 64], sizes = [8, 64], strides = [1, 1]} : vector<8x128xf32> to vector<8x64xf32>
    %22 = vector.extract_strided_slice %13 {offsets = [0, 128], sizes = [8, 64], strides = [1, 1]} : vector<8x256xf32> to vector<8x64xf32>
    %23 = math.tanh %22 : vector<8x64xf32>
    %24 = vector.extract_strided_slice %13 {offsets = [0, 192], sizes = [8, 64], strides = [1, 1]} : vector<8x256xf32> to vector<8x64xf32>
    %25 = vector.shape_cast %5 : vector<4x8x128xf32> to vector<32x128xf32>
    %26 = arith.truncf %25 : vector<32x128xf32> to vector<32x128xbf16>
    %cst_15 = arith.constant dense<0.000000e+00> : vector<32x64xf32>
    %27 = tpu.matmul %26, %2, %cst_15 {dimension_numbers = #tpu.dot_dimension_numbers<[1], [0], [0], [1], [0, 0, 1, 1], [], []>} : vector<32x128xbf16>, vector<128x64xbf16>, vector<32x64xf32> -> vector<32x64xf32>
    %28 = vector.shape_cast %27 : vector<32x64xf32> to vector<4x8x64xf32>
    %29 = vector.shape_cast %24 : vector<8x64xf32> to vector<1x8x64xf32>
    %30 = vector.broadcast %29 : vector<1x8x64xf32> to vector<4x8x64xf32>
    %31 = arith.addf %28, %30 : vector<4x8x64xf32>
    %32 = arith.negf %31 : vector<4x8x64xf32>
    %33 = math.exp %32 : vector<4x8x64xf32>
    %cst_16 = arith.constant 1.000000e+00 : f32
    %34 = vector.broadcast %cst_16 : f32 to vector<4x8x64xf32>
    %35 = arith.addf %34, %33 : vector<4x8x64xf32>
    %36 = arith.divf %34, %35 : vector<4x8x64xf32>
    %37 = vector.extract_strided_slice %5 {offsets = [0, 0, 64], sizes = [4, 8, 64], strides = [1, 1, 1]} : vector<4x8x128xf32> to vector<4x8x64xf32>
    %38 = arith.mulf %36, %37 : vector<4x8x64xf32>
    %cst_17 = arith.constant dense<0.000000e+00> : vector<8x64xf32>
    %39 = vector.multi_reduction <add>, %38, %cst_17 [0] : vector<4x8x64xf32> to vector<8x64xf32>
    %40 = arith.mulf %20, %23 : vector<8x64xf32>
    %41 = arith.addf %40, %39 : vector<8x64xf32>
    %42 = math.tanh %41 : vector<8x64xf32>
    %43 = arith.mulf %21, %42 : vector<8x64xf32>
    %44 = tpu.concatenate %43, %41 in 1 : vector<8x64xf32>, vector<8x64xf32> -> vector<8x128xf32>
    %c0_18 = arith.constant 0 : index
    %c0_19 = arith.constant 0 : index
    %45 = vector.load %arg7[%c0_18, %c0_19] : memref<8x128xf32, #tpu.memory_space<vmem>>, vector<8x128xf32>
    tpu.vector_store %arg7[%c0_18, %c0_19], %44 {strides = array<i32>} : memref<8x128xf32, #tpu.memory_space<vmem>>, vector<8x128xf32>,
    return
  }
  func.func @transform_0(%arg0: i32) -> (i32, i32) {
    %c0_i32 = arith.constant 0 : i32
    %c0_i32_0 = arith.constant 0 : i32
    return %arg0, %c0_i32 : i32, i32
  }
  func.func @transform_1(%arg0: i32) -> (i32, i32, i32) {
    %c0_i32 = arith.constant 0 : i32
    %c0_i32_0 = arith.constant 0 : i32
    %c0_i32_1 = arith.constant 0 : i32
    return %c0_i32, %arg0, %c0_i32_0 : i32, i32, i32
  }
  func.func @transform_2(%arg0: i32) -> (i32, i32) {
    %c0_i32 = arith.constant 0 : i32
    %c0_i32_0 = arith.constant 0 : i32
    %c0_i32_1 = arith.constant 0 : i32
    return %c0_i32, %c0_i32_0 : i32, i32
  }
  func.func @transform_3(%arg0: i32) -> (i32, i32) {
    %c0_i32 = arith.constant 0 : i32
    %c0_i32_0 = arith.constant 0 : i32
    %c0_i32_1 = arith.constant 0 : i32
    return %c0_i32, %c0_i32_0 : i32, i32
  }
  func.func @transform_4(%arg0: i32) -> (i32, i32) {
    %c0_i32 = arith.constant 0 : i32
    %c0_i32_0 = arith.constant 0 : i32
    %c0_i32_1 = arith.constant 0 : i32
    return %c0_i32, %c0_i32_0 : i32, i32
  }
  func.func @transform_5(%arg0: i32) -> (i32, i32) {
    %c0_i32 = arith.constant 0 : i32
    %c0_i32_0 = arith.constant 0 : i32
    %c0_i32_1 = arith.constant 0 : i32
    return %c0_i32, %c0_i32_0 : i32, i32
  }
  func.func @transform_6(%arg0: i32) -> (i32, i32) {
    %c0_i32 = arith.constant 0 : i32
    %c0_i32_0 = arith.constant 0 : i32
    return %arg0, %c0_i32 : i32, i32
  }
}

</mosaic_0001>

<bundles_post_ra>
// kernel: tpu_custom_call.1
= control target key start
LH: loop header
LB: loop body
LE: loop exit
PB: predicated region body
PF: predicated region fallthrough
CT: control target
= control target key end

     0   :  { %s1520_s0 = inlined_call_operand.hbm [shape: f32[16,32], index: 0, kind: input, shape index: {}]   ;;  %s1521_s1 = inlined_call_operand.vmem [shape: f32[4,16,128], index: 1, kind: input, shape index: {}]   ;;  %s1522_s2 = inlined_call_operand.vmem [shape: bf16[32,256], index: 2, kind: input, shape index: {}]   ;;  %s1523_s3 = inlined_call_operand.hbm [shape: bf16[128,256], index: 3, kind: input, shape index: {}]   ;;  %s1524_s4 = inlined_call_operand.vmem [shape: bf16[128,64], index: 4, kind: input, shape index: {}]   ;;  %s1525_s5 = inlined_call_operand.vmem [shape: f32[1,256], index: 5, kind: input, shape index: {}]   ;;  %s1526_s6 = inlined_call_operand.hbm [shape: f32[16,128], index: 6, kind: output, shape index: {}]  }
   0x1   :  { %1533 = sst [smem:[#allocation12_spill]] %s1523_s3 }
   0x2   :  { %11 = vsyncpa [#allocation3], 0 }
   0x3   :  { %13 = vsyncpa [#allocation3 + $0x1], 0 }
   0x4   :  { %14 = vsyncpa [#allocation7], 0 }
   0x5   :  { %15 = vsyncpa [#allocation4], 0 }
   0x6   :  { %17 = vsyncpa [#allocation4 + $0x1], 0  ;;  %s1260_s21 = smov 0   ;;  %s1262_s22 = smov 0  }
   0x7   :  { %s1264_s23 = smov 0   ;;  %s1266_s24 = smov 0  }
   0x8 LB: > { %s1281_s25 = sadd.s32 4294967295, %s1216_s24   ;;  %s891_s26 = sadd.s32 4294967294, %s1216_s24   ;;  %s1216_s24 = sphi %s1266_s24, %s1552_s24   ;;  %s1212_s23 = sphi %s1264_s23, %s1551_s23   ;;  %s1208_s22 = sphi %s1262_s22, %s1550_s22   ;;  %s1204_s21 = sphi %s1260_s21, %s1549_s21  }
   0x9   : > { %s1285_s27 = sadd.s32 1, %s1216_s24   ;;  %s30_s28 = sadd.s32 1, %s1212_s23 }
   0xa   : > { %s27_s29 = ssub.s32 %s1216_s24, %s1285_s27  ;;  %p37_p0 = scmp.ne.s32.totalorder %s1212_s23, %s1208_s22 }
   0xb   : > { %p28_p1 = scmp.eq.s32.totalorder %s27_s29, 0  ;;  %p38_p2 = scmp.eq.s32.totalorder %s1216_s24, 0 }
   0xc   : > { %p43_p3 = scmp.ne.s32.totalorder %s1208_s22, %s1204_s21  ;;  %p1527_p4 = scmp.eq.s32.totalorder %s1281_s25, 0 }
   0xd   : > { %s1297_s30 = scalar_select %p28_p1, %s1212_s23, %s30_s28  }
   0xe   : > { %p1299_p5 = por %p38_p2, %p37_p0  ;;  %p1305_p6 = por %p1527_p4, %p43_p3 }
   0xf   : > { %p177_p7 = scmp.eq.s32.totalorder %s1281_s25, 1  ;;  %p183_p8 = scmp.eq.s32.totalorder %s891_s26, 1 }
  0x10   : > { %s1534_s7 = scalar_select %p1299_p5, 1, 0 }
  0x11   : > { %s1535_s8 = scalar_select %p1305_p6, 1, 0 }
  0x12   : > { %p892_p9 = scmp.ge.s32.totalorder %s1216_s24, 1  ;;  %p190_p10 = scmp.lt.s32.totalorder %s1216_s24, 3 }
  0x13   : > { %p1312_p11 = por %p177_p7, %p37_p0  ;;  %p1316_p12 = por %p183_p8, %p43_p3 }
  0x14   : > { %p1320_p13 = pnand %p892_p9, %p190_p10  ;;  %s1218_s12 = smov [#allocation6]  }
  0x15   : > { %s1536_s9 = scalar_select %p1312_p11, 1, 0 }
  0x16   : > { %s1537_s10 = scalar_select %p1316_p12, 1, 0 }
  0x17   : > { %s1538_s11 = scalar_select %p1320_p13, 1, 0 }
  0x18   : > { %p980_p1 = pneg %p1320_p13  ;;  %s205_s13 = sshll.u32 %s1218_s12, 4  ;;  %s206_s13 = int_to_ptr.vmem [resolvable:$true] %s205_s13 }
  0x19   : > { %s1540_s3 = sld [smem:[#allocation12_spill]] }
  0x1a   : > { %p1328_p2 = pnand %p980_p1, %p1527_p4 }
  0x1c   : > { %p1092_p3 = pneg %p1328_p2 }
  0x1f   : > { %s1090_s17 = scalar_lea.hbm %s1540_s3, 2048 }
  0x20   : > { %p1091_p0 = scmp.ne.s32.totalorder %s1540_s3, %s1090_s17  ;;  %p1097_p9 = scmp.lt.u32.totalorder %s1090_s17, %s1540_s3 }
  0x22   : > { %p1093_p7 = pnand %p1092_p3, %p1091_p0 }
  0x24   : > { %p1094_p8 = pneg %p1093_p7 }
  0x26   : > { %p1099_p10 = pnand %p1097_p9, %p1094_p8 }
  0x28   : > { %1102 = shalt.err (!%p1099_p10)
}
  0x29   : > { %s1103_s28 = scalar_lea.vmem %s206_s13, 2048  ;;  %p1111_p11 = scmp.lt.s32.totalorder %s206_s13, %s206_s13 }
  0x2a   : > { %p1104_p1 = scmp.ne.s32.totalorder %s206_s13, %s1103_s28  ;;  %p1112_p6 = scmp.lt.s32.totalorder %s1103_s28, %s1103_s28 }
  0x2c   : > { %p1106_p4 = pnand %p1104_p1, %p1092_p3  ;;  %p1113_p13 = por %p1112_p6, %p1111_p11 }
  0x2e   : > { %p1107_p12 = pneg %p1106_p4 }
  0x30   : > { %p1114_p5 = pnand %p1113_p13, %p1107_p12 }
  0x32   : > { %1117 = shalt.err (!%p1114_p5)
}
  0x33   : > { %s1219_s29 = smov 128   ;;  %s1220_s12 = smov 8  }
  0x34   : > { %983 = dma.hbm_to_vmem [thread:$0]  (!%p1328_p2), %s1540_s3, 2048, %s206_s13, [#allocation7], %s1219_s29, %s1219_s29, %s1220_s12  }
  0x35   : > { %p1532_p0 = scmp.ge.s32.totalorder %s1216_s24, 2 }
  0x36   : > { %s1352_s17 = sand.u32 (!%p1532_p0), 1, %s1212_s23   ;;  %s896_s18 = sshll.u32 (!%p1532_p0), %s1216_s24, 7 }
  0x37   : > { %221 = sbr.rel (%p1532_p0) target bundleno = 87 (0x57), region = 32  ;;  %s895_s19 = sshll.u32 (!%p1532_p0), %s1352_s17, 3 }
  0x38   : > { %s1359_s26 = scalar_lea.hbm (!%p1532_p0), %s1520_s0, %s896_s18  ;;  %s229_s13 = scalar_lea.vmem (!%p1532_p0), [#allocation2], %s895_s19 }
  0x39   : > { %s236_s28 = sshll.u32 (!%p1532_p0), %s229_s13, 4  ;;  %s226_s29 = scalar_lea.sflag (!%p1532_p0), [#allocation3], %s1352_s17  ;;  %s237_s28 = int_to_ptr.vmem [resolvable:$true] %s236_s28 }
  0x3a   : > { %s1118_s12 = scalar_lea.hbm (!%p1532_p0), %s1359_s26, 128  ;;  %p1541_p5 = scmp.ne.s32.totalorder (!%p1532_p0), %s1534_s7, 0 }
  0x3b   : > { %p1119_p4 = scmp.ne.s32.totalorder (!%p1532_p0), %s1359_s26, %s1118_s12  ;;  %s1122_s3 = scalar_lea.hbm (!%p1532_p0), %s1520_s0, 256 }
  0x3c   : > { %p1123_p12 = scmp.lt.u32.totalorder (!%p1532_p0), %s1359_s26, %s1520_s0  ;;  %p1124_p13 = scmp.lt.u32.totalorder (!%p1532_p0), %s1122_s3, %s1118_s12 }
  0x3d   : > { %p1120_p6 = pnand (!%p1532_p0), %p1119_p4, %p1541_p5  ;;  %p1126_p3 = scmp.lt.u32.totalorder (!%p1532_p0), %s1118_s12, %s1359_s26 }
  0x3e   : > { %p1125_p2 = por %p1124_p13, %p1123_p12 }
  0x3f   : > { %p1121_p11 = pneg %p1120_p6 }
  0x40   : > { %p1127_p7 = por %p1126_p3, %p1125_p2 }
  0x42   : > { %p1128_p8 = pnand %p1127_p7, %p1121_p11 }
  0x44   : > { %1131 = shalt.err (!%p1128_p8)
}
  0x45   : > { %s1132_s19 = scalar_lea.vmem %s237_s28, 128  ;;  %s1221_s14 = smov [#allocation2]  }
  0x46   : > { %p1133_p9 = scmp.ne.s32.totalorder %s237_s28, %s1132_s19  ;;  %s1136_s13 = sshll.u32 %s1221_s14, 4  ;;  %s1137_s13 = int_to_ptr.vmem [resolvable:$false] %s1136_s13 }
  0x47   : > { %s1138_s15 = scalar_lea.vmem %s1137_s13, 256  ;;  %p1139_p4 = scmp.lt.s32.totalorder %s237_s28, %s1137_s13 }
  0x48   : > { %p1134_p10 = pnand %p1133_p9, %p1541_p5  ;;  %p1140_p6 = scmp.lt.s32.totalorder %s1138_s15, %s1132_s19 }
  0x4a   : > { %p1135_p1 = pneg %p1134_p10  ;;  %p1141_p0 = por %p1140_p6, %p1139_p4 }
  0x4c   : > { %p1142_p12 = pnand %p1141_p0, %p1135_p1 }
  0x4e   : > { %1145 = shalt.err (!%p1142_p12)
}
  0x4f   : > { %974 = dma.hbm_to_vmem [thread:$0]  (%p1541_p5), %s1359_s26, 128, %s237_s28, %s226_s29  }
  0x50   : > { %242 = sbr.rel (!%p1541_p5) target bundleno = 87 (0x57), region = 40  ;;  %s897_s3 = sshll.u32 (%p1541_p5), %s1352_s17, 5 }
  0x51   : > { %s898_s12 = sshll.u32 (%p1541_p5), %s1216_s24, 3  ;;  %s246_s19 = scalar_lea.vmem (%p1541_p5), [#allocation5], %s897_s3 }
  0x52   : > { %s248_s18 = scalar_lea.vmem (%p1541_p5), %s1521_s1, %s898_s12 }
  0x53   : > { %v282_v0 = vld [vmem:[%s248_s18] sm:$0xff] (%p1541_p5)  ;;  %v284_v1 = vld [vmem:[%s248_s18 + $0x10] sm:$0xff] (%p1541_p5) }
  0x54   : > { %v286_v2 = vld [vmem:[%s248_s18 + $0x20] sm:$0xff] (%p1541_p5)  ;;  %283 = vst [vmem:[%s246_s19] sm:$0xff] (%p1541_p5), %v282_v0  ;;  %285 = vst [vmem:[%s246_s19 + $0x8] sm:$0xff] (%p1541_p5), %v284_v1  ;;  %v288_v3 = vld [vmem:[%s248_s18 + $0x30] sm:$0xff] (%p1541_p5) }
  0x55   : > { %287 = vst [vmem:[%s246_s19 + $0x10] sm:$0xff] (%p1541_p5), %v286_v2  ;;  %289 = vst [vmem:[%s246_s19 + $0x18] sm:$0xff] (%p1541_p5), %v288_v3 }
  0x57 PF: > { %p1542_p0 = scmp.ne.s32.totalorder %s1538_s11, 0 }
  0x58   : > { %s1389_s7 = sand.u32 (!%p1542_p0), 1, %s1208_s22   ;;  %p1543_p5 = scmp.ne.s32.totalorder (!%p1542_p0), %s1535_s8, 0 }
  0x59   : > { %298 = sbr.rel (%p1542_p0) target bundleno = 764 (0x2fc), region = 78  ;;  %s900_s17 = sshll.u32 (!%p1542_p0), %s1389_s7, 3 }
  0x5a   : > { %s301_s26 = scalar_lea.sflag (!%p1542_p0), [#allocation3], %s1389_s7  ;;  %s1395_s28 = scalar_lea.vmem (!%p1542_p0), [#allocation2], %s900_s17 }
  0x60   : > { %1191 = dma.done.wait (%p1543_p5), %s301_s26, 128  }
  0x61   : > { %1193 = vsyncadd (%p1543_p5), %s301_s26, 4294967168  ;;  %s901_s11 = sshll.u32 %s1389_s7, 5  ;;  %p1544_p11 = scmp.eq.s32.totalorder %s1281_s25, 0 }
  0x62   : > { %s1402_s29 = scalar_lea.vmem [#allocation5], %s901_s11 }
  0x63   : > { %1195 = dma.done.wait (%p1544_p11), [#allocation7], 2048   ;;  %p1545_p13 = pmov %p1544_p11 }
  0x64   : > { %v1222_v4 = vmov 0   ;;  %v1028_v5 = vld [vmem:[#allocation6 + $0x4] ss:$8 sps:$4 sm:$0xff]   ;;  %v1030_v6 = vld [vmem:[#allocation6] ss:$8 sps:$4 sm:$0xff]   ;;  %v386_v19 = vld [vmem:[%s1395_s28] sm:$0xff]  ;;  %v583_v45 = vlaneseq }
  0x65   : > { %1197 = vsyncadd (%p1545_p13), [#allocation7], 4294965248  ;;  %573 = vmatprep.mubr.bf16.mxu1 %v1222_v4  ;;  %508 = vmatprep.mubr.bf16.mxu0 %v1222_v4  ;;  %v1031_v7 = vld [vmem:[#allocation6 + $0x14] ss:$8 sps:$4 sm:$0xff]   ;;  %v1033_v8 = vld [vmem:[#allocation6 + $0x10] ss:$8 sps:$4 sm:$0xff]   ;;  %v394_v21 = vpack.c.bf16 %v386_v19, %v386_v19 }
  0x66   : > { %476 = vmatprep.subr.bf16.mxu0 %v1028_v5  ;;  %v1034_v9 = vld [vmem:[#allocation6 + $0x24] ss:$8 sps:$4 sm:$0xff]   ;;  %v1036_v10 = vld [vmem:[#allocation6 + $0x20] ss:$8 sps:$4 sm:$0xff]   ;;  %v1037_v11 = vld [vmem:[#allocation6 + $0x34] ss:$8 sps:$4 sm:$0xff]  }
  0x67   : > { %477 = vmatpush1.bf16.msra.mxu0 %v1030_v6  ;;  %v1046_v12 = vld [vmem:[%s1522_s2 + $0x4] ss:$8 sps:$4 sm:$0xff]   ;;  %v1048_v13 = vld [vmem:[%s1522_s2] ss:$8 sps:$4 sm:$0xff]   ;;  %v1052_v15 = vld [vmem:[%s1522_s2 + $0x14] ss:$8 sps:$4 sm:$0xff]  }
  0x68   : > { %478 = vmatprep.subr.bf16.mxu0 %v1031_v7  ;;  %v1039_v14 = vld [vmem:[#allocation6 + $0x30] ss:$8 sps:$4 sm:$0xff]   ;;  %541 = vmatprep.subr.bf16.mxu1 %v1046_v12  ;;  %v1054_v16 = vld [vmem:[%s1522_s2 + $0x10] ss:$8 sps:$4 sm:$0xff]   ;;  %v1040_v17 = vld [vmem:[#allocation6 + $0x44] ss:$8 sps:$4 sm:$0xff]  }
  0x69   : > { %542 = vmatpush1.bf16.msra.mxu1 %v1048_v13  ;;  %v1042_v18 = vld [vmem:[#allocation6 + $0x40] ss:$8 sps:$4 sm:$0xff]   ;;  %v1043_v20 = vld [vmem:[#allocation6 + $0x54] ss:$8 sps:$4 sm:$0xff]   ;;  %vm537_vm0 = vcmask 261120   ;;  %v584_v46 = vshrl.u32 %v583_v45, 7 }
  0x6a   : > { %543 = vmatprep.subr.bf16.mxu1 %v1052_v15  ;;  %v1422_v22 = vld [vmem:[%s1402_s29] sm:$0xff]  ;;  %v388_v23 = vld [vmem:[%s1402_s29 + $0x8] sm:$0xff]  ;;  %v1058_v24 = vld [vmem:[%s1524_s4] sm:$0xff]   ;;  %s1223_s28 = smov 64   ;;  %vm753_vm1 = vcmask 523264   ;;  %s939_s8 = sshll.u32 %s1281_s25, 7 }
  0x6b   : > { %479 = vmatpush1.bf16.msra.mxu0 %v1033_v8  ;;  %v1059_v25 = vld [vmem:[%s1524_s4 + $0x8] sm:$0xff]   ;;  %v602_v27 = vpack.c.bf16 %v388_v23, %v1422_v22  ;;  %v1049_v28 = vld [vmem:[#allocation6 + $0x64] ss:$8 sps:$4 sm:$0xff]   ;;  %v391_v29 = vadd.f32 %v388_v23, %v1422_v22  ;;  %v389_v30 = vld [vmem:[%s1402_s29 + $0x10] sm:$0xff]  ;;  %v585_v48 = vsub.s32 0, %v584_v46  ;;  %739 = vrot.lane.b32.xlu1 %v388_v23, %s1223_s28  ;;  %v589_v54 = vsub.s32 1, %v584_v46 }
  0x6c   : > { %480 = vmatprep.subr.bf16.mxu0 %v1034_v9  ;;  %v1045_v26 = vld [vmem:[#allocation6 + $0x50] ss:$8 sps:$4 sm:$0xff]   ;;  %v1060_v31 = vld [vmem:[%s1524_s4 + $0x10] sm:$0xff]   ;;  %v1055_v35 = vld [vmem:[#allocation6 + $0x74] ss:$8 sps:$4 sm:$0xff]   ;;  %s347_s14 = scalar_lea.vmem [#allocation8], %s900_s17 }
  0x6d   : > { %544 = vmatpush1.bf16.msra.mxu1 %v1054_v16  ;;  %v392_v32 = vadd.f32 %v391_v29, %v389_v30  ;;  %v1051_v33 = vld [vmem:[#allocation6 + $0x60] ss:$8 sps:$4 sm:$0xff]   ;;  %v390_v34 = vld [vmem:[%s1402_s29 + $0x18] sm:$0xff]  ;;  %v1062_v39 = vld [vmem:[%s1524_s4 + $0x20] sm:$0xff]   ;;  %s793_s13 = sshll.u32 %s347_s14, 4  ;;  %s1475_s29 = scalar_lea.hbm %s1526_s6, %s939_s8  ;;  %s1477_s13 = int_to_ptr.vmem [resolvable:$true] %s793_s13 }
  0x6e   : > { %952 = vmatprep.subr.bf16.mxu1 %v1058_v24  ;;  %v1061_v36 = vld [vmem:[%s1524_s4 + $0x18] sm:$0xff]   ;;  %v1057_v38 = vld [vmem:[#allocation6 + $0x70] ss:$8 sps:$4 sm:$0xff]   ;;  %v1064_v42 = vld [vmem:[%s1524_s4 + $0x30] sm:$0xff]   ;;  %v603_v44 = vpack.c.bf16 %v390_v34, %v389_v30  ;;  %s780_s12 = scalar_lea.sflag [#allocation4], %s1389_s7  ;;  %s1146_s25 = scalar_lea.vmem %s1477_s13, 128 }
  0x6f   : > { %481 = vmatpush1.bf16.msra.mxu0 %v1036_v10  ;;  %v393_v37 = vadd.f32 %v392_v32, %v390_v34  ;;  %v1063_v41 = vld [vmem:[%s1524_s4 + $0x28] sm:$0xff]   ;;  %v1065_v43 = vld [vmem:[%s1524_s4 + $0x38] sm:$0xff]   ;;  %v385_v47 = vld [vmem:[%s1525_s5] sm:$0x3]  ;;  %741 = vrot.lane.b32.xlu1 %v389_v30, %s1223_s28  ;;  %p1147_p2 = scmp.ne.s32.totalorder %s1477_s13, %s1146_s25  ;;  %p1546_p3 = scmp.ne.s32.totalorder %s1536_s9, 0 }
  0x70   : > { %482 = vmatprep.subr.bf16.mxu0 %v1037_v11  ;;  %924 = vmatmul.mubr.msk.bf16.vlgmr.msra.gmra.mrb[0].mxu1 %vm537_vm0, %v394_v21  ;;  %v586_v49 = vrot.slane %v385_v47, %v585_v48  ;;  %v590_v56 = vrot.slane %v385_v47, %v589_v54  ;;  %s1224_s17 = smov [#allocation8]  }
  0x71   : > { %953 = vmatpush3.bf16.msra.mxu1 %v1058_v24  ;;  %968 = vmatprep.mubr.bf16.mxu1 %v602_v27  ;;  %v395_v40 = vpack.c.bf16 %v393_v37, %v393_v37  ;;  %p1148_p7 = pnand %p1147_p2, %p1546_p3  ;;  %s1150_s16 = sshll.u32 %s1224_s17, 4  ;;  %s1151_s16 = int_to_ptr.vmem [resolvable:$false] %s1150_s16 }
  0x72   : > { %954 = vmatprep.subr.bf16.mxu1 %v1059_v25  ;;  %s1152_s20 = scalar_lea.vmem %s1151_s16, 256  ;;  %p1153_p9 = scmp.lt.s32.totalorder %s1477_s13, %s1151_s16 }
  0x73   : > { %483 = vmatpush1.bf16.msra.mxu0 %v1039_v14  ;;  %p1149_p8 = pneg %p1148_p7  ;;  %p1154_p10 = scmp.lt.s32.totalorder %s1152_s20, %s1146_s25 }
  0x74   : > { %484 = vmatprep.subr.bf16.mxu0 %v1040_v17 }
  0x75   : > { %955 = vmatpush3.bf16.msra.mxu1 %v1059_v25  ;;  %p1155_p1 = por %p1154_p10, %p1153_p9 }
  0x76   : > { %956 = vmatprep.subr.bf16.mxu1 %v1060_v31 }
  0x77   : > { %485 = vmatpush1.bf16.msra.mxu0 %v1042_v18  ;;  %p1156_p4 = pnand %p1155_p1, %p1149_p8 }
  0x78   : > { %486 = vmatprep.subr.bf16.mxu0 %v1043_v20 }
  0x79   : > { %957 = vmatpush3.bf16.msra.mxu1 %v1060_v31 }
  0x7a   : > { %958 = vmatprep.subr.bf16.mxu1 %v1061_v36 }
  0x7b   : > { %487 = vmatpush1.bf16.msra.mxu0 %v1045_v26 }
  0x7c   : > { %488 = vmatprep.subr.bf16.mxu0 %v1049_v28 }
  0x7d   : > { %959 = vmatpush3.bf16.msra.mxu1 %v1061_v36 }
  0x7e   : > { %960 = vmatprep.subr.bf16.mxu1 %v1062_v39 }
  0x7f   : > { %489 = vmatpush1.bf16.msra.mxu0 %v1051_v33 }
  0x80   : > { %490 = vmatprep.subr.bf16.mxu0 %v1055_v35 }
  0x81   : > { %961 = vmatpush3.bf16.msra.mxu1 %v1062_v39 }
  0x82   : > { %962 = vmatprep.subr.bf16.mxu1 %v1063_v41 }
  0x83   : > { %491 = vmatpush1.bf16.msra.mxu0 %v1057_v38 }
  0x85   : > { %963 = vmatpush3.bf16.msra.mxu1 %v1063_v41 }
  0x86   : > { %509 = vmatmul.mubr.bf16.vlgmr.msra.gmra.mrb[0].mxu0 %v395_v40  ;;  %964 = vmatprep.subr.bf16.mxu1 %v1064_v42 }
  0x89   : > { %965 = vmatpush3.bf16.msra.mxu1 %v1064_v42 }
  0x8a   : > { %966 = vmatprep.subr.bf16.mxu1 %v1065_v43 }
  0x8d   : > { %967 = vmatpush3.bf16.msra.mxu1 %v1065_v43 }
  0x90   : > { %969 = vmatmul.mubr.bf16.vlgmr.msra.gmra.mrb[4].mxu1 %v603_v44 }
  0xdd   : > { %v740_v24 = vpop.permute.xlu1 %739 }
  0xe1   : > { %v742_v27 = vpop.permute.xlu1 %741 }
 0x143   : > { %v575_v50 = vpop.f32.mrb[0].mxu1 }
 0x144   : > { %v577_v51 = vpop.f32.mrb[1].mxu1 }
 0x145   : > { %v579_v52 = vpop.f32.mrb[2].mxu1 }
 0x146   : > { %v580_v53 = vpop.f32.mrb[3].mxu1 }
 0x159   : > { %v510_v55 = vpop.f32.mrb[0].mxu0 }
 0x15a   : > { %v576_v57 = vadd.f32 %v575_v50, %v510_v55  ;;  %v512_v58 = vpop.f32.mrb[1].mxu0 }
 0x15b   : > { %v578_v59 = vadd.f32 %v577_v51, %v512_v58  ;;  %v514_v60 = vpop.f32.mrb[2].mxu0 }
 0x15c   : > { %v593_v61 = vadd.f32 %v586_v49, %v576_v57  ;;  %v515_v62 = vpop.f32.mrb[3].mxu0 }
 0x15d   : > { %v594_v63 = vadd.f32 %v590_v56, %v578_v59 }
 0x15e   : > { %v925_v4 = vmul.f32 -1.442695, %v593_v61 }
 0x15f   : > { %702 = vrot.lane.b32.xlu0 %v594_v63, %s1223_s28 }
 0x160   : > { %1066 = vpow2.f32 %v925_v4 }
 0x163   : > { %737 = vrot.lane.b32.xlu0 %v1422_v22, %s1223_s28  ;;  %v970_v0 = vpop.f32.mrb[4].mxu1 }
 0x164   : > { %v686_v1 = vpop.f32.mrb[5].mxu1 }
 0x165   : > { %v971_v2 = vpop.f32.mrb[6].mxu1 }
 0x166   : > { %v689_v3 = vpop.f32.mrb[7].mxu1 }
 0x167   : > { %743 = vrot.lane.b32.xlu0 %v390_v34, %s1223_s28 }
 0x16a   : > { %v1067_v14 = vpop.eup %1066 }
 0x16b   : > { %v598_v23 = vadd.f32 1.0, %v1067_v14 }
 0x1d1   : > { %v703_v5 = vpop.permute.xlu0 %702 }
 0x1d2   : > { %v705_v6 = vadd.f32 %v703_v5, %v686_v1  ;;  %v706_v7 = vadd.f32 %v703_v5, %v689_v3  ;;  %v707_v8 = vadd.f32 %v970_v0, %v703_v5  ;;  %v708_v9 = vadd.f32 %v971_v2, %v703_v5 }
 0x1d4   : > { %v934_v10 = vmul.f32 -1.442695, %v705_v6  ;;  %v935_v11 = vmul.f32 -1.442695, %v706_v7  ;;  %v936_v12 = vmul.f32 -1.442695, %v707_v8 }
 0x1d5   : > { %v937_v13 = vmul.f32 -1.442695, %v708_v9  ;;  %v738_v25 = vpop.permute.xlu0 %737 }
 0x1d6   : > { %1068 = vpow2.f32 %v934_v10 }
 0x1d7   : > { %1070 = vpow2.f32 %v935_v11 }
 0x1d8   : > { %1072 = vpow2.f32 %v936_v12 }
 0x1d9   : > { %1074 = vpow2.f32 %v937_v13  ;;  %v744_v30 = vpop.permute.xlu0 %743 }
 0x1e0   : > { %v1069_v15 = vpop.eup %1068 }
 0x1e1   : > { %v1071_v16 = vpop.eup %1070  ;;  %v721_v17 = vadd.f32 1.0, %v1069_v15 }
 0x1e2   : > { %v1073_v18 = vpop.eup %1072  ;;  %v722_v19 = vadd.f32 1.0, %v1071_v16 }
 0x1e3   : > { %v1075_v20 = vpop.eup %1074  ;;  %v723_v21 = vadd.f32 1.0, %v1073_v18  ;;  %1076 = vrcp.f32 %v721_v17 }
 0x1e4   : > { %v724_v22 = vadd.f32 1.0, %v1075_v20  ;;  %1078 = vrcp.f32 %v722_v19 }
 0x1e5   : > { %1080 = vrcp.f32 %v723_v21 }
 0x1e6   : > { %1082 = vrcp.f32 %v724_v22 }
 0x1e7   : > { %1084 = vrcp.f32 %v598_v23 }
 0x1e8   : > { %1086 = vtanh.f32 %v594_v63 }
 0x1ed   : > { %v1077_v26 = vpop.eup %1076 }
 0x1ee   : > { %v1079_v28 = vpop.eup %1078  ;;  %v749_v29 = vmul.f32 %v1077_v26, %v738_v25 }
 0x1ef   : > { %v1081_v31 = vpop.eup %1080  ;;  %v750_v32 = vmul.f32 %v1079_v28, %v740_v24 }
 0x1f0   : > { %v1083_v33 = vpop.eup %1082  ;;  %v754_v34 = vsel %vm753_vm1, %v749_v29, 0.0  ;;  %v751_v35 = vmul.f32 %v1081_v31, %v742_v27 }
 0x1f1   : > { %v755_v36 = vsel %vm753_vm1, %v750_v32, 0.0  ;;  %v752_v37 = vmul.f32 %v1083_v33, %v744_v30  ;;  %v1085_v39 = vpop.eup %1084 }
 0x1f2   : > { %v756_v38 = vadd.f32 %v755_v36, %v754_v34  ;;  %v757_v40 = vsel %vm753_vm1, %v751_v35, 0.0  ;;  %v1087_v42 = vpop.eup %1086 }
 0x1f3   : > { %v759_v43 = vsel %vm753_vm1, %v752_v37, 0.0  ;;  %v761_v45 = vmul.f32 %v1087_v42, %v1085_v39 }
 0x1f4   : > { %v758_v41 = vadd.f32 %v757_v40, %v756_v38 }
 0x1f6   : > { %v760_v44 = vadd.f32 %v759_v43, %v758_v41 }
 0x1f8   : > { %v762_v46 = vadd.f32 %v761_v45, %v760_v44 }
 0x1fa   : > { %1088 = vtanh.f32 %v762_v46 }
 0x204   : > { %v1089_v47 = vpop.eup %1088 }
 0x205   : > { %765 = vrot.lane.b32.xlu1 %v1089_v47, %s1223_s28 }
 0x209   : > { %774 = vrot.lane.b32.xlu1 %v762_v46, %s1223_s28 }
 0x277   : > { %v766_v48 = vpop.permute.xlu1 %765 }
 0x278   : > { %v768_v49 = vmul.f32 %v1085_v39, %v766_v48 }
 0x27a   : > { %770 = vrot.lane.b32.xlu0 %v768_v49, %s1223_s28 }
 0x27b   : > { %v775_v50 = vpop.permute.xlu1 %774 }
 0x2ec   : > { %v771_v51 = vpop.permute.xlu0 %770 }
 0x2ed   : > { %v777_v52 = vsel %vm753_vm1, %v771_v51, %v775_v50 }
 0x2ee   : > { %778 = vst [vmem:[%s347_s14] sm:$0xff] %v777_v52 }
 0x2ef   : > { %1159 = shalt.err (!%p1156_p4)
}
 0x2f0   : > { %s1160_s7 = scalar_lea.hbm %s1475_s29, 128  ;;  %s1164_s26 = scalar_lea.hbm %s1526_s6, 256 }
 0x2f1   : > { %p1161_p6 = scmp.ne.s32.totalorder %s1475_s29, %s1160_s7  ;;  %p1165_p5 = scmp.lt.u32.totalorder %s1475_s29, %s1526_s6 }
 0x2f2   : > { %p1166_p11 = scmp.lt.u32.totalorder %s1164_s26, %s1160_s7  ;;  %p1168_p2 = scmp.lt.u32.totalorder %s1160_s7, %s1475_s29 }
 0x2f3   : > { %p1162_p12 = pnand %p1161_p6, %p1546_p3 }
 0x2f4   : > { %p1167_p13 = por %p1166_p11, %p1165_p5 }
 0x2f5   : > { %p1163_p0 = pneg %p1162_p12 }
 0x2f6   : > { %p1169_p7 = por %p1168_p2, %p1167_p13 }
 0x2f8   : > { %p1170_p8 = pnand %p1169_p7, %p1163_p0 }
 0x2fa   : > { %1173 = shalt.err (!%p1170_p8)
}
 0x2fb   : > { %978 = dma.vmem_to_hbm [thread:$0]  (%p1546_p3), %s1477_s13, 128, %s1475_s29, %s780_s12  }
 0x2fc PF: > { %s805_s8 = sand.u32 1, %s1204_s21   ;;  %p1547_p9 = scmp.ne.s32.totalorder %s1537_s10, 0 }
 0x2fd   : > { %p1548_p10 = scmp.ge.s32.totalorder %s1216_s24, 2  ;;  %s806_s14 = scalar_lea.sflag [#allocation4], %s805_s8 }
 0x2ff   : > { %p985_p1 = pnand %p1548_p10, %p1547_p9 }
 0x301   : > { %1199 = dma.done.wait (!%p985_p1), %s806_s14, 128  }
 0x302   : > { %1201 = vsyncadd (!%p985_p1), %s806_s14, 4294967168  ;;  %p20_p4 = scmp.ge.s32.totalorder %s1285_s27, 4   ;;  %s1549_s21 = smov %s1208_s22 }
 0x303   : > { %s1550_s22 = smov %s1212_s23  ;;  %s1551_s23 = smov %s1297_s30 }
 0x304   : > { %s1552_s24 = smov %s1285_s27  ;;  %22 = sbr.rel (!%p20_p4) target bundleno = 8 (0x8), region = 139 }
 0x30b   :  { %811 = vsyncpa [#allocation3], 1 }
 0x30c   :  { %813 = vsyncpa [#allocation3 + $0x1], 1 }
 0x30d   :  { %814 = vsyncpa [#allocation7], 1 }
 0x30e   :  { %815 = vsyncpa [#allocation4], 1 }
 0x30f   :  { %817 = vsyncpa [#allocation4 + $0x1], 1 }

</bundles_post_ra>
